<compile_context>
chip_gen: v6e
topology: v6e:2x2x1
jax: 0.10.0
libtpu: 0.0.40
codegen_flags: <defaults>
</compile_context>

<pallas_src>
import jax
import jax.numpy as jnp
from jax import lax
from jax.experimental import pallas as pl
from jax.experimental.pallas import tpu as pltpu

VMEM_SPEC = pl.BlockSpec(memory_space=pltpu.MemorySpace.VMEM)
SMEM_SPEC = pl.BlockSpec(memory_space=pltpu.MemorySpace.SMEM)


# ---------------------------------------------------------------------------
# Fused Pallas kernel: entire Model1 forward
# ---------------------------------------------------------------------------
def _model1_fused_kernel(adj_s_ref, adj_sf_ref, x_ref, nx_ref, keep_ref,
                         w_enc_ref, b_enc_ref, w_dec_ref, b_dec_ref,
                         gamma_ref, beta_ref,
                         hi_ref, loss_ref):
    n = x_ref.shape[0]
    latent = w_enc_ref.shape[1]

    x = x_ref[...]
    n_x = nx_ref[...]
    x_p = x * keep_ref[...]                      # mask_feature(x, p=0.2), fill 0

    adj_s = adj_s_ref[...]
    adj_sf = adj_sf_ref[...]

    # GCN "improved" normalization fused in:  A_hat = D^-1/2 (A + 2I) D^-1/2,
    # deg = rowsum(A) + 2, applied as row/col scalings around the raw-A matmul.
    dinv_s = lax.rsqrt(jnp.sum(adj_s, axis=1, keepdims=True) + 2.0)     # [N, 1]
    dinv_sf = lax.rsqrt(jnp.sum(adj_sf, axis=1, keepdims=True) + 2.0)   # [N, 1]

    def agg(adj, dinv, v):
        # A_hat @ v  ==  dinv * (A @ (dinv * v) + 2 * (dinv * v))
        sv = dinv * v
        return dinv * (jnp.dot(adj, sv, preferred_element_type=jnp.float32)
                       + 2.0 * sv)

    # --- batched encoder projection: one MXU op for x / x_p / n_x -------------
    w_enc = w_enc_ref[...]                       # [in, latent]
    b_enc = b_enc_ref[...]                       # [1, latent]
    stacked = jnp.concatenate([x, x_p, n_x], axis=0)                     # [3N, in]
    proj = jnp.dot(stacked, w_enc, preferred_element_type=jnp.float32)   # [3N, L]
    xw_x = proj[:n]
    xw_xp = proj[n:2 * n]
    xw_nx = proj[2 * n:]

    # --- the two A_s aggregations share one matmul ----------------------------
    agg_s = agg(adj_s, dinv_s, jnp.concatenate([xw_x, xw_nx], axis=1))   # [N, 2L]
    hio = agg_s[:, :latent] + b_enc              # encoder(x,   s_edge)
    enc_nx = agg_s[:, latent:] + b_enc           # encoder(n_x, s_edge)
    enc_xp = agg(adj_sf, dinv_sf, xw_xp) + b_enc  # encoder(x_p, sf_edge)

    # --- decoder, reordered to (A_hat @ H) @ W_dec (N^2 term over latent) -----
    hi = jnp.dot(agg(adj_s, dinv_s, hio), w_dec_ref[...],
                 preferred_element_type=jnp.float32) + b_dec_ref[...]
    hi_ref[...] = hi

    # --- BatchNorm1d (training-mode batch stats, eps=1e-5) + ELU --------------
    gamma = gamma_ref[...]
    beta = beta_ref[...]

    def bn_elu(h):
        inv_rows = 1.0 / h.shape[0]
        mean = jnp.sum(h, axis=0, keepdims=True) * inv_rows
        ex2 = jnp.sum(h * h, axis=0, keepdims=True) * inv_rows
        var = ex2 - mean * mean                  # single-pass, biased (matches norm)
        y = (h - mean) * lax.rsqrt(var + 1e-5) * gamma + beta
        return jnp.where(y > 0, y, jnp.exp(jnp.minimum(y, 0.0)) - 1.0)

    h0 = bn_elu(hio)
    h1 = bn_elu(enc_xp)
    h2 = bn_elu(enc_nx)

    # --- loss = MSE(x, hi) + InfoNCE(h0, h1, negatives=h2, T=0.05, unpaired) --
    d = x - hi
    mse = jnp.sum(d * d) / float(d.size)

    def l2norm(v):
        nrm = jnp.sqrt(jnp.sum(v * v, axis=-1, keepdims=True))
        return v / jnp.maximum(nrm, 1e-12)       # F.normalize semantics

    inv_temp = 1.0 / 0.05
    q = l2norm(h0) * inv_temp                    # 1/T folded into the query once
    pk = l2norm(h1)
    nk = l2norm(h2)

    pos = jnp.sum(q * pk, axis=1, keepdims=True)                       # [N, 1]
    neg = lax.dot_general(q, nk, (((1,), (1,)), ((), ())),
                          preferred_element_type=jnp.float32)          # [N, N]

    # cross_entropy with label 0 == logsumexp([pos, neg]) - pos
    m = jnp.maximum(pos, jnp.max(neg, axis=1, keepdims=True))
    lse = m + jnp.log(jnp.exp(pos - m) +
                      jnp.sum(jnp.exp(neg - m), axis=1, keepdims=True))
    info = jnp.sum(lse - pos) / float(n)

    loss_ref[0, 0] = mse + info                  # scalar straight to SMEM


# ---------------------------------------------------------------------------
# Wrapper around the single pallas_call
# ---------------------------------------------------------------------------
def model1_forward(params, x, n_x, s_adj, sf_adj, mask_key):
    n, in_dim = x.shape
    latent = params["w_enc"].shape[0]

    # mask_feature(x, p=0.2): column-wise random feature mask (fill value 0).
    keep = (jax.random.uniform(mask_key, (1, in_dim)) >= 0.2).astype(x.dtype)

    w_enc_t = params["w_enc"].T                  # [in, latent]
    w_dec_t = params["w_dec"].T                  # [latent, in]

    flops = int(2 * (3 * n * in_dim * latent        # batched encoder projection
                     + n * n * 2 * latent           # shared A_s aggregation
                     + n * n * latent                # A_sf aggregation
                     + n * n * latent                # decoder A_s aggregation
                     + n * latent * in_dim           # decoder projection
                     + n * latent * n))              # InfoNCE negatives
    transcendentals = int(3 * n * latent + n * (n + 1) + 4 * n)
    bytes_accessed = int(4 * (2 * n * n + 3 * n * in_dim + in_dim
                              + 2 * in_dim * latent + 3 * latent + in_dim) + 4)

    hi, loss = pl.pallas_call(
        _model1_fused_kernel,
        out_shape=(
            jax.ShapeDtypeStruct((n, in_dim), jnp.float32),   # hi
            jax.ShapeDtypeStruct((1, 1), jnp.float32),        # scalar loss
        ),
        in_specs=[VMEM_SPEC] * 11,
        out_specs=(VMEM_SPEC, SMEM_SPEC),
        compiler_params=pltpu.CompilerParams(vmem_limit_bytes=8 * 1024 * 1024),
        cost_estimate=pl.CostEstimate(flops=flops,
                                      transcendentals=transcendentals,
                                      bytes_accessed=bytes_accessed),
    )(s_adj, sf_adj, x, n_x, keep,
      w_enc_t, params["b_enc"].reshape(1, -1),
      w_dec_t, params["b_dec"].reshape(1, -1),
      params["gamma"].reshape(1, -1), params["beta"].reshape(1, -1))

    return hi, loss[0, 0]


# ---------------------------------------------------------------------------
# Plain-JAX parameter init (glue, not kernel work)
# ---------------------------------------------------------------------------
def init_params(key, in_dim, latent_dim):
    k1, k2, k3, k4 = jax.random.split(key, 4)
    glorot = lambda k, fan_out, fan_in: jax.random.uniform(
        k, (fan_out, fan_in), jnp.float32,
        -jnp.sqrt(6.0 / (fan_in + fan_out)), jnp.sqrt(6.0 / (fan_in + fan_out)))
    return {
        "w_enc": glorot(k1, latent_dim, in_dim),   # GCNConv lin weight [out, in]
        "b_enc": jax.random.normal(k2, (latent_dim,), jnp.float32) * 0.01,
        "w_dec": glorot(k3, in_dim, latent_dim),
        "b_dec": jax.random.normal(k4, (in_dim,), jnp.float32) * 0.01,
        "gamma": jnp.ones((latent_dim,), jnp.float32),   # BatchNorm weight
        "beta": jnp.zeros((latent_dim,), jnp.float32),   # BatchNorm bias
    }
    # TODO(synk): batch_emb / SpatialConstrain are declared in Model1.__init__ but
    # unused in Model1.forward, so they are not instantiated here.


# ---------------------------------------------------------------------------
if __name__ == "__main__":
    N, IN_DIM, LATENT = 16, 16, 8

    root = jax.random.PRNGKey(0)
    k_par, k_x, k_nx, k_e1, k_e2, k_mask = jax.random.split(root, 6)

    params = init_params(k_par, IN_DIM, LATENT)

    x = jax.random.normal(k_x, (N, IN_DIM), jnp.float32)
    n_x = jax.random.normal(k_nx, (N, IN_DIM), jnp.float32)

    def rand_adj(key):
        m = (jax.random.uniform(key, (N, N)) < 0.2).astype(jnp.float32)
        m = jnp.maximum(m, m.T)                       # symmetric
        return m * (1.0 - jnp.eye(N, dtype=jnp.float32))

    s_adj = rand_adj(k_e1)    # dense form of s_edge_index
    sf_adj = rand_adj(k_e2)   # dense form of sf_edge_index

    hi, loss = model1_forward(params, x, n_x, s_adj, sf_adj, k_mask)
    jax.block_until_ready((hi, loss))

    assert hi.shape == (N, IN_DIM)
    assert jnp.isfinite(loss)
    print("KERNEL_OK")
</pallas_src>

<mosaic_0001>
module attributes {stable_mosaic.version = 11 : i64} {
  func.func @_model1_fused_kernel(%arg0: memref<16x16xf32, #tpu.memory_space<vmem>>, %arg1: memref<16x16xf32, #tpu.memory_space<vmem>>, %arg2: memref<16x16xf32, #tpu.memory_space<vmem>>, %arg3: memref<16x16xf32, #tpu.memory_space<vmem>>, %arg4: memref<1x16xf32, #tpu.memory_space<vmem>>, %arg5: memref<16x8xf32, #tpu.memory_space<vmem>>, %arg6: memref<1x8xf32, #tpu.memory_space<vmem>>, %arg7: memref<8x16xf32, #tpu.memory_space<vmem>>, %arg8: memref<1x16xf32, #tpu.memory_space<vmem>>, %arg9: memref<1x8xf32, #tpu.memory_space<vmem>>, %arg10: memref<1x8xf32, #tpu.memory_space<vmem>>, %arg11: memref<16x16xf32, #tpu.memory_space<vmem>>, %arg12: memref<1x1xf32, #tpu.memory_space<smem>>) attributes {dimension_semantics = [], scalar_prefetch = 0 : i64, scratch_operands = 0 : i64, tpu.core_type = #tpu.core_type<tc>} {
    %c0 = arith.constant 0 : index
    %c0_0 = arith.constant 0 : index
    %0 = vector.load %arg2[%c0, %c0_0] : memref<16x16xf32, #tpu.memory_space<vmem>>, vector<16x16xf32>
    %c0_1 = arith.constant 0 : index
    %c0_2 = arith.constant 0 : index
    %1 = vector.load %arg3[%c0_1, %c0_2] : memref<16x16xf32, #tpu.memory_space<vmem>>, vector<16x16xf32>
    %c0_3 = arith.constant 0 : index
    %c0_4 = arith.constant 0 : index
    %2 = vector.load %arg4[%c0_3, %c0_4] : memref<1x16xf32, #tpu.memory_space<vmem>>, vector<1x16xf32>
    %3 = vector.broadcast %2 : vector<1x16xf32> to vector<16x16xf32>
    %4 = arith.mulf %0, %3 : vector<16x16xf32>
    %c0_5 = arith.constant 0 : index
    %c0_6 = arith.constant 0 : index
    %5 = vector.load %arg0[%c0_5, %c0_6] : memref<16x16xf32, #tpu.memory_space<vmem>>, vector<16x16xf32>
    %c0_7 = arith.constant 0 : index
    %c0_8 = arith.constant 0 : index
    %6 = vector.load %arg1[%c0_7, %c0_8] : memref<16x16xf32, #tpu.memory_space<vmem>>, vector<16x16xf32>
    %cst = arith.constant dense<0.000000e+00> : vector<16xf32>
    %7 = vector.multi_reduction <add>, %5, %cst [1] : vector<16x16xf32> to vector<16xf32>
    %8 = vector.shape_cast %7 : vector<16xf32> to vector<16x1xf32>
    %cst_9 = arith.constant 2.000000e+00 : f32
    %9 = vector.broadcast %cst_9 : f32 to vector<16x1xf32>
    %10 = arith.addf %8, %9 : vector<16x1xf32>
    %11 = math.rsqrt %10 : vector<16x1xf32>
    %cst_10 = arith.constant dense<0.000000e+00> : vector<16xf32>
    %12 = vector.multi_reduction <add>, %6, %cst_10 [1] : vector<16x16xf32> to vector<16xf32>
    %13 = vector.shape_cast %12 : vector<16xf32> to vector<16x1xf32>
    %cst_11 = arith.constant 2.000000e+00 : f32
    %14 = vector.broadcast %cst_11 : f32 to vector<16x1xf32>
    %15 = arith.addf %13, %14 : vector<16x1xf32>
    %16 = math.rsqrt %15 : vector<16x1xf32>
    %c0_12 = arith.constant 0 : index
    %c0_13 = arith.constant 0 : index
    %17 = vector.load %arg5[%c0_12, %c0_13] : memref<16x8xf32, #tpu.memory_space<vmem>>, vector<16x8xf32>
    %c0_14 = arith.constant 0 : index
    %c0_15 = arith.constant 0 : index
    %18 = vector.load %arg6[%c0_14, %c0_15] : memref<1x8xf32, #tpu.memory_space<vmem>>, vector<1x8xf32>
    %19 = tpu.concatenate %0, %4, %1 in 0 : vector<16x16xf32>, vector<16x16xf32>, vector<16x16xf32> -> vector<48x16xf32>
    %cst_16 = arith.constant dense<0.000000e+00> : vector<48x8xf32>
    %20 = tpu.matmul %19, %17, %cst_16 {dimension_numbers = #tpu.dot_dimension_numbers<[1], [0], [0], [1], [0, 0, 1, 1], [], []>} : vector<48x16xf32>, vector<16x8xf32>, vector<48x8xf32> -> vector<48x8xf32>
    %21 = vector.extract_strided_slice %20 {offsets = [0, 0], sizes = [16, 8], strides = [1, 1]} : vector<48x8xf32> to vector<16x8xf32>
    %22 = vector.extract_strided_slice %20 {offsets = [16, 0], sizes = [16, 8], strides = [1, 1]} : vector<48x8xf32> to vector<16x8xf32>
    %23 = vector.extract_strided_slice %20 {offsets = [32, 0], sizes = [16, 8], strides = [1, 1]} : vector<48x8xf32> to vector<16x8xf32>
    %24 = tpu.concatenate %21, %23 in 1 : vector<16x8xf32>, vector<16x8xf32> -> vector<16x16xf32>
    %25 = vector.broadcast %11 : vector<16x1xf32> to vector<16x16xf32>
    %26 = arith.mulf %25, %24 : vector<16x16xf32>
    %cst_17 = arith.constant dense<0.000000e+00> : vector<16x16xf32>
    %27 = tpu.matmul %5, %26, %cst_17 {dimension_numbers = #tpu.dot_dimension_numbers<[1], [0], [0], [1], [0, 0, 1, 1], [], []>} : vector<16x16xf32>, vector<16x16xf32>, vector<16x16xf32> -> vector<16x16xf32>
    %cst_18 = arith.constant 2.000000e+00 : f32
    %28 = vector.broadcast %cst_18 : f32 to vector<16x16xf32>
    %29 = arith.mulf %28, %26 : vector<16x16xf32>
    %30 = arith.addf %27, %29 : vector<16x16xf32>
    %31 = vector.broadcast %11 : vector<16x1xf32> to vector<16x16xf32>
    %32 = arith.mulf %31, %30 : vector<16x16xf32>
    %33 = vector.extract_strided_slice %32 {offsets = [0, 0], sizes = [16, 8], strides = [1, 1]} : vector<16x16xf32> to vector<16x8xf32>
    %34 = vector.broadcast %18 : vector<1x8xf32> to vector<16x8xf32>
    %35 = arith.addf %33, %34 : vector<16x8xf32>
    %36 = vector.extract_strided_slice %32 {offsets = [0, 8], sizes = [16, 8], strides = [1, 1]} : vector<16x16xf32> to vector<16x8xf32>
    %37 = vector.broadcast %18 : vector<1x8xf32> to vector<16x8xf32>
    %38 = arith.addf %36, %37 : vector<16x8xf32>
    %39 = vector.broadcast %16 : vector<16x1xf32> to vector<16x8xf32>
    %40 = arith.mulf %39, %22 : vector<16x8xf32>
    %cst_19 = arith.constant dense<0.000000e+00> : vector<16x8xf32>
    %41 = tpu.matmul %6, %40, %cst_19 {dimension_numbers = #tpu.dot_dimension_numbers<[1], [0], [0], [1], [0, 0, 1, 1], [], []>} : vector<16x16xf32>, vector<16x8xf32>, vector<16x8xf32> -> vector<16x8xf32>
    %cst_20 = arith.constant 2.000000e+00 : f32
    %42 = vector.broadcast %cst_20 : f32 to vector<16x8xf32>
    %43 = arith.mulf %42, %40 : vector<16x8xf32>
    %44 = arith.addf %41, %43 : vector<16x8xf32>
    %45 = vector.broadcast %16 : vector<16x1xf32> to vector<16x8xf32>
    %46 = arith.mulf %45, %44 : vector<16x8xf32>
    %47 = vector.broadcast %18 : vector<1x8xf32> to vector<16x8xf32>
    %48 = arith.addf %46, %47 : vector<16x8xf32>
    %49 = vector.broadcast %11 : vector<16x1xf32> to vector<16x8xf32>
    %50 = arith.mulf %49, %35 : vector<16x8xf32>
    %cst_21 = arith.constant dense<0.000000e+00> : vector<16x8xf32>
    %51 = tpu.matmul %5, %50, %cst_21 {dimension_numbers = #tpu.dot_dimension_numbers<[1], [0], [0], [1], [0, 0, 1, 1], [], []>} : vector<16x16xf32>, vector<16x8xf32>, vector<16x8xf32> -> vector<16x8xf32>
    %cst_22 = arith.constant 2.000000e+00 : f32
    %52 = vector.broadcast %cst_22 : f32 to vector<16x8xf32>
    %53 = arith.mulf %52, %50 : vector<16x8xf32>
    %54 = arith.addf %51, %53 : vector<16x8xf32>
    %55 = vector.broadcast %11 : vector<16x1xf32> to vector<16x8xf32>
    %56 = arith.mulf %55, %54 : vector<16x8xf32>
    %c0_23 = arith.constant 0 : index
    %c0_24 = arith.constant 0 : index
    %57 = vector.load %arg7[%c0_23, %c0_24] : memref<8x16xf32, #tpu.memory_space<vmem>>, vector<8x16xf32>
    %cst_25 = arith.constant dense<0.000000e+00> : vector<16x16xf32>
    %58 = tpu.matmul %56, %57, %cst_25 {dimension_numbers = #tpu.dot_dimension_numbers<[1], [0], [0], [1], [0, 0, 1, 1], [], []>} : vector<16x8xf32>, vector<8x16xf32>, vector<16x16xf32> -> vector<16x16xf32>
    %c0_26 = arith.constant 0 : index
    %c0_27 = arith.constant 0 : index
    %59 = vector.load %arg8[%c0_26, %c0_27] : memref<1x16xf32, #tpu.memory_space<vmem>>, vector<1x16xf32>
    %60 = vector.broadcast %59 : vector<1x16xf32> to vector<16x16xf32>
    %61 = arith.addf %58, %60 : vector<16x16xf32>
    %c0_28 = arith.constant 0 : index
    %c0_29 = arith.constant 0 : index
    %62 = vector.load %arg11[%c0_28, %c0_29] : memref<16x16xf32, #tpu.memory_space<vmem>>, vector<16x16xf32>
    tpu.vector_store %arg11[%c0_28, %c0_29], %61 {strides = array<i32>} : memref<16x16xf32, #tpu.memory_space<vmem>>, vector<16x16xf32>,
    %c0_30 = arith.constant 0 : index
    %c0_31 = arith.constant 0 : index
    %63 = vector.load %arg9[%c0_30, %c0_31] : memref<1x8xf32, #tpu.memory_space<vmem>>, vector<1x8xf32>
    %c0_32 = arith.constant 0 : index
    %c0_33 = arith.constant 0 : index
    %64 = vector.load %arg10[%c0_32, %c0_33] : memref<1x8xf32, #tpu.memory_space<vmem>>, vector<1x8xf32>
    %cst_34 = arith.constant dense<0.000000e+00> : vector<8xf32>
    %65 = vector.multi_reduction <add>, %35, %cst_34 [0] : vector<16x8xf32> to vector<8xf32>
    %66 = vector.shape_cast %65 : vector<8xf32> to vector<1x8xf32>
    %cst_35 = arith.constant 6.250000e-02 : f32
    %67 = vector.broadcast %cst_35 : f32 to vector<1x8xf32>
    %68 = arith.mulf %66, %67 : vector<1x8xf32>
    %69 = arith.mulf %35, %35 : vector<16x8xf32>
    %cst_36 = arith.constant dense<0.000000e+00> : vector<8xf32>
    %70 = vector.multi_reduction <add>, %69, %cst_36 [0] : vector<16x8xf32> to vector<8xf32>
    %71 = vector.shape_cast %70 : vector<8xf32> to vector<1x8xf32>
    %cst_37 = arith.constant 6.250000e-02 : f32
    %72 = vector.broadcast %cst_37 : f32 to vector<1x8xf32>
    %73 = arith.mulf %71, %72 : vector<1x8xf32>
    %74 = arith.mulf %68, %68 : vector<1x8xf32>
    %75 = arith.subf %73, %74 : vector<1x8xf32>
    %76 = vector.broadcast %68 : vector<1x8xf32> to vector<16x8xf32>
    %77 = arith.subf %35, %76 : vector<16x8xf32>
    %cst_38 = arith.constant 9.99999974E-6 : f32
    %78 = vector.broadcast %cst_38 : f32 to vector<1x8xf32>
    %79 = arith.addf %75, %78 : vector<1x8xf32>
    %80 = math.rsqrt %79 : vector<1x8xf32>
    %81 = vector.broadcast %80 : vector<1x8xf32> to vector<16x8xf32>
    %82 = arith.mulf %77, %81 : vector<16x8xf32>
    %83 = vector.broadcast %63 : vector<1x8xf32> to vector<16x8xf32>
    %84 = arith.mulf %82, %83 : vector<16x8xf32>
    %85 = vector.broadcast %64 : vector<1x8xf32> to vector<16x8xf32>
    %86 = arith.addf %84, %85 : vector<16x8xf32>
    %cst_39 = arith.constant 0.000000e+00 : f32
    %87 = vector.broadcast %cst_39 : f32 to vector<16x8xf32>
    %88 = arith.cmpf ogt, %86, %87 : vector<16x8xf32>
    %cst_40 = arith.constant 0.000000e+00 : f32
    %89 = vector.broadcast %cst_40 : f32 to vector<16x8xf32>
    %90 = arith.minimumf %86, %89 : vector<16x8xf32>
    %91 = math.exp %90 : vector<16x8xf32>
    %cst_41 = arith.constant 1.000000e+00 : f32
    %92 = vector.broadcast %cst_41 : f32 to vector<16x8xf32>
    %93 = arith.subf %91, %92 : vector<16x8xf32>
    %94 = arith.select %88, %86, %93 : vector<16x8xi1>, vector<16x8xf32>
    %cst_42 = arith.constant dense<0.000000e+00> : vector<8xf32>
    %95 = vector.multi_reduction <add>, %48, %cst_42 [0] : vector<16x8xf32> to vector<8xf32>
    %96 = vector.shape_cast %95 : vector<8xf32> to vector<1x8xf32>
    %cst_43 = arith.constant 6.250000e-02 : f32
    %97 = vector.broadcast %cst_43 : f32 to vector<1x8xf32>
    %98 = arith.mulf %96, %97 : vector<1x8xf32>
    %99 = arith.mulf %48, %48 : vector<16x8xf32>
    %cst_44 = arith.constant dense<0.000000e+00> : vector<8xf32>
    %100 = vector.multi_reduction <add>, %99, %cst_44 [0] : vector<16x8xf32> to vector<8xf32>
    %101 = vector.shape_cast %100 : vector<8xf32> to vector<1x8xf32>
    %cst_45 = arith.constant 6.250000e-02 : f32
    %102 = vector.broadcast %cst_45 : f32 to vector<1x8xf32>
    %103 = arith.mulf %101, %102 : vector<1x8xf32>
    %104 = arith.mulf %98, %98 : vector<1x8xf32>
    %105 = arith.subf %103, %104 : vector<1x8xf32>
    %106 = vector.broadcast %98 : vector<1x8xf32> to vector<16x8xf32>
    %107 = arith.subf %48, %106 : vector<16x8xf32>
    %cst_46 = arith.constant 9.99999974E-6 : f32
    %108 = vector.broadcast %cst_46 : f32 to vector<1x8xf32>
    %109 = arith.addf %105, %108 : vector<1x8xf32>
    %110 = math.rsqrt %109 : vector<1x8xf32>
    %111 = vector.broadcast %110 : vector<1x8xf32> to vector<16x8xf32>
    %112 = arith.mulf %107, %111 : vector<16x8xf32>
    %113 = vector.broadcast %63 : vector<1x8xf32> to vector<16x8xf32>
    %114 = arith.mulf %112, %113 : vector<16x8xf32>
    %115 = vector.broadcast %64 : vector<1x8xf32> to vector<16x8xf32>
    %116 = arith.addf %114, %115 : vector<16x8xf32>
    %cst_47 = arith.constant 0.000000e+00 : f32
    %117 = vector.broadcast %cst_47 : f32 to vector<16x8xf32>
    %118 = arith.cmpf ogt, %116, %117 : vector<16x8xf32>
    %cst_48 = arith.constant 0.000000e+00 : f32
    %119 = vector.broadcast %cst_48 : f32 to vector<16x8xf32>
    %120 = arith.minimumf %116, %119 : vector<16x8xf32>
    %121 = math.exp %120 : vector<16x8xf32>
    %cst_49 = arith.constant 1.000000e+00 : f32
    %122 = vector.broadcast %cst_49 : f32 to vector<16x8xf32>
    %123 = arith.subf %121, %122 : vector<16x8xf32>
    %124 = arith.select %118, %116, %123 : vector<16x8xi1>, vector<16x8xf32>
    %cst_50 = arith.constant dense<0.000000e+00> : vector<8xf32>
    %125 = vector.multi_reduction <add>, %38, %cst_50 [0] : vector<16x8xf32> to vector<8xf32>
    %126 = vector.shape_cast %125 : vector<8xf32> to vector<1x8xf32>
    %cst_51 = arith.constant 6.250000e-02 : f32
    %127 = vector.broadcast %cst_51 : f32 to vector<1x8xf32>
    %128 = arith.mulf %126, %127 : vector<1x8xf32>
    %129 = arith.mulf %38, %38 : vector<16x8xf32>
    %cst_52 = arith.constant dense<0.000000e+00> : vector<8xf32>
    %130 = vector.multi_reduction <add>, %129, %cst_52 [0] : vector<16x8xf32> to vector<8xf32>
    %131 = vector.shape_cast %130 : vector<8xf32> to vector<1x8xf32>
    %cst_53 = arith.constant 6.250000e-02 : f32
    %132 = vector.broadcast %cst_53 : f32 to vector<1x8xf32>
    %133 = arith.mulf %131, %132 : vector<1x8xf32>
    %134 = arith.mulf %128, %128 : vector<1x8xf32>
    %135 = arith.subf %133, %134 : vector<1x8xf32>
    %136 = vector.broadcast %128 : vector<1x8xf32> to vector<16x8xf32>
    %137 = arith.subf %38, %136 : vector<16x8xf32>
    %cst_54 = arith.constant 9.99999974E-6 : f32
    %138 = vector.broadcast %cst_54 : f32 to vector<1x8xf32>
    %139 = arith.addf %135, %138 : vector<1x8xf32>
    %140 = math.rsqrt %139 : vector<1x8xf32>
    %141 = vector.broadcast %140 : vector<1x8xf32> to vector<16x8xf32>
    %142 = arith.mulf %137, %141 : vector<16x8xf32>
    %143 = vector.broadcast %63 : vector<1x8xf32> to vector<16x8xf32>
    %144 = arith.mulf %142, %143 : vector<16x8xf32>
    %145 = vector.broadcast %64 : vector<1x8xf32> to vector<16x8xf32>
    %146 = arith.addf %144, %145 : vector<16x8xf32>
    %cst_55 = arith.constant 0.000000e+00 : f32
    %147 = vector.broadcast %cst_55 : f32 to vector<16x8xf32>
    %148 = arith.cmpf ogt, %146, %147 : vector<16x8xf32>
    %cst_56 = arith.constant 0.000000e+00 : f32
    %149 = vector.broadcast %cst_56 : f32 to vector<16x8xf32>
    %150 = arith.minimumf %146, %149 : vector<16x8xf32>
    %151 = math.exp %150 : vector<16x8xf32>
    %cst_57 = arith.constant 1.000000e+00 : f32
    %152 = vector.broadcast %cst_57 : f32 to vector<16x8xf32>
    %153 = arith.subf %151, %152 : vector<16x8xf32>
    %154 = arith.select %148, %146, %153 : vector<16x8xi1>, vector<16x8xf32>
    %155 = arith.subf %0, %61 : vector<16x16xf32>
    %156 = arith.mulf %155, %155 : vector<16x16xf32>
    %157 = vector.shape_cast %156 : vector<16x16xf32> to vector<1x16x16xf32>
    %cst_58 = arith.constant dense<0.000000e+00> : vector<1xf32>
    %158 = vector.multi_reduction <add>, %157, %cst_58 [1, 2] : vector<1x16x16xf32> to vector<1xf32>
    %159 = vector.shape_cast %158 : vector<1xf32> to vector<1x1x1xf32>
    %160 = vector.extract %159[0, 0, 0] : f32 from vector<1x1x1xf32>
    %cst_59 = arith.constant 2.560000e+02 : f32
    %161 = arith.divf %160, %cst_59 : f32
    %162 = arith.mulf %94, %94 : vector<16x8xf32>
    %cst_60 = arith.constant dense<0.000000e+00> : vector<16xf32>
    %163 = vector.multi_reduction <add>, %162, %cst_60 [1] : vector<16x8xf32> to vector<16xf32>
    %164 = vector.shape_cast %163 : vector<16xf32> to vector<16x1xf32>
    %165 = math.sqrt %164 : vector<16x1xf32>
    %cst_61 = arith.constant 9.99999996E-13 : f32
    %166 = vector.broadcast %cst_61 : f32 to vector<16x1xf32>
    %167 = arith.maximumf %165, %166 : vector<16x1xf32>
    %168 = vector.broadcast %167 : vector<16x1xf32> to vector<16x8xf32>
    %169 = arith.divf %94, %168 : vector<16x8xf32>
    %cst_62 = arith.constant 2.000000e+01 : f32
    %170 = vector.broadcast %cst_62 : f32 to vector<16x8xf32>
    %171 = arith.mulf %169, %170 : vector<16x8xf32>
    %172 = arith.mulf %124, %124 : vector<16x8xf32>
    %cst_63 = arith.constant dense<0.000000e+00> : vector<16xf32>
    %173 = vector.multi_reduction <add>, %172, %cst_63 [1] : vector<16x8xf32> to vector<16xf32>
    %174 = vector.shape_cast %173 : vector<16xf32> to vector<16x1xf32>
    %175 = math.sqrt %174 : vector<16x1xf32>
    %cst_64 = arith.constant 9.99999996E-13 : f32
    %176 = vector.broadcast %cst_64 : f32 to vector<16x1xf32>
    %177 = arith.maximumf %175, %176 : vector<16x1xf32>
    %178 = vector.broadcast %177 : vector<16x1xf32> to vector<16x8xf32>
    %179 = arith.divf %124, %178 : vector<16x8xf32>
    %180 = arith.mulf %154, %154 : vector<16x8xf32>
    %cst_65 = arith.constant dense<0.000000e+00> : vector<16xf32>
    %181 = vector.multi_reduction <add>, %180, %cst_65 [1] : vector<16x8xf32> to vector<16xf32>
    %182 = vector.shape_cast %181 : vector<16xf32> to vector<16x1xf32>
    %183 = math.sqrt %182 : vector<16x1xf32>
    %cst_66 = arith.constant 9.99999996E-13 : f32
    %184 = vector.broadcast %cst_66 : f32 to vector<16x1xf32>
    %185 = arith.maximumf %183, %184 : vector<16x1xf32>
    %186 = vector.broadcast %185 : vector<16x1xf32> to vector<16x8xf32>
    %187 = arith.divf %154, %186 : vector<16x8xf32>
    %188 = arith.mulf %171, %179 : vector<16x8xf32>
    %cst_67 = arith.constant dense<0.000000e+00> : vector<16xf32>
    %189 = vector.multi_reduction <add>, %188, %cst_67 [1] : vector<16x8xf32> to vector<16xf32>
    %190 = vector.shape_cast %189 : vector<16xf32> to vector<16x1xf32>
    %cst_68 = arith.constant dense<0.000000e+00> : vector<16x16xf32>
    %191 = tpu.matmul %171, %187, %cst_68 {dimension_numbers = #tpu.dot_dimension_numbers<[1], [1], [0], [0], [0, 0, 1, 0], [], []>} : vector<16x8xf32>, vector<16x8xf32>, vector<16x16xf32> -> vector<16x16xf32>
    %cst_69 = arith.constant dense<0xFF800000> : vector<16xf32>
    %192 = vector.multi_reduction <maximumf>, %191, %cst_69 [1] : vector<16x16xf32> to vector<16xf32>
    %193 = vector.shape_cast %192 : vector<16xf32> to vector<16x1xf32>
    %194 = arith.maximumf %190, %193 : vector<16x1xf32>
    %195 = arith.subf %190, %194 : vector<16x1xf32>
    %196 = math.exp %195 : vector<16x1xf32>
    %197 = vector.broadcast %194 : vector<16x1xf32> to vector<16x16xf32>
    %198 = arith.subf %191, %197 : vector<16x16xf32>
    %199 = math.exp %198 : vector<16x16xf32>
    %cst_70 = arith.constant dense<0.000000e+00> : vector<16xf32>
    %200 = vector.multi_reduction <add>, %199, %cst_70 [1] : vector<16x16xf32> to vector<16xf32>
    %201 = vector.shape_cast %200 : vector<16xf32> to vector<16x1xf32>
    %202 = arith.addf %196, %201 : vector<16x1xf32>
    %203 = math.log %202 : vector<16x1xf32>
    %204 = arith.addf %194, %203 : vector<16x1xf32>
    %205 = arith.subf %204, %190 : vector<16x1xf32>
    %206 = vector.shape_cast %205 : vector<16x1xf32> to vector<1x16x1xf32>
    %cst_71 = arith.constant dense<0.000000e+00> : vector<1xf32>
    %207 = vector.multi_reduction <add>, %206, %cst_71 [1, 2] : vector<1x16x1xf32> to vector<1xf32>
    %208 = vector.shape_cast %207 : vector<1xf32> to vector<1x1x1xf32>
    %209 = vector.extract %208[0, 0, 0] : f32 from vector<1x1x1xf32>
    %cst_72 = arith.constant 1.600000e+01 : f32
    %210 = arith.divf %209, %cst_72 : f32
    %211 = arith.addf %161, %210 : f32
    %c0_73 = arith.constant 0 : index
    %c0_74 = arith.constant 0 : index
    %212 = memref.load %arg12[%c0_73, %c0_74] : memref<1x1xf32, #tpu.memory_space<smem>>
    memref.store %211, %arg12[%c0_73, %c0_74] : memref<1x1xf32, #tpu.memory_space<smem>>
    return
  }
}

</mosaic_0001>

<bundles_post_ra>
// kernel: tpu_custom_call.1
= control target key start
LH: loop header
LB: loop body
LE: loop exit
PB: predicated region body
PF: predicated region fallthrough
CT: control target
= control target key end

     0   :  { %18 = vsyncpa [#allocation3], 0  ;;  %s1689_s0 = inlined_call_operand.vmem [shape: f32[16,16], index: 0, kind: input, shape index: {}]   ;;  %s1690_s1 = inlined_call_operand.hbm [shape: f32[16,16], index: 1, kind: input, shape index: {}]   ;;  %s1691_s2 = inlined_call_operand.hbm [shape: f32[16,16], index: 2, kind: input, shape index: {}]   ;;  %s1692_s3 = inlined_call_operand.hbm [shape: f32[16,16], index: 3, kind: input, shape index: {}]   ;;  %s1693_s4 = inlined_call_operand.vmem [shape: f32[1,16], index: 4, kind: input, shape index: {}]   ;;  %s1694_s5 = inlined_call_operand.vmem [shape: f32[16,8], index: 5, kind: input, shape index: {}]   ;;  %s1695_s6 = inlined_call_operand.vmem [shape: f32[1,8], index: 6, kind: input, shape index: {}]   ;;  %s1696_s7 = inlined_call_operand.vmem [shape: f32[8,16], index: 7, kind: input, shape index: {}]   ;;  %s1697_s8 = inlined_call_operand.vmem [shape: f32[1,16], index: 8, kind: input, shape index: {}]   ;;  %s1698_s9 = inlined_call_operand.vmem [shape: f32[1,8], index: 9, kind: input, shape index: {}]   ;;  %s1699_s10 = inlined_call_operand.vmem [shape: f32[1,8], index: 10, kind: input, shape index: {}]   ;;  %s1700_s11 = inlined_call_operand.hbm [shape: f32[16,16], index: 11, kind: output, shape index: {0}]   ;;  %s1701_s12 = inlined_call_operand.hbm [shape: f32[1,1], index: 12, kind: output, shape index: {1}]  }
   0x1   :  { %19 = vsyncpa [#allocation7], 0 }
   0x2   :  { %20 = vsyncpa [#allocation4], 0 }
   0x3   :  { %21 = vsyncpa [#allocation5], 0  ;;  %s1338_s21 = smov [#allocation6]   ;;  %s1339_s23 = smov [#allocation2]  }
   0x4   :  { %s41_s22 = sshll.u32 %s1338_s21, 4  ;;  %s29_s24 = sshll.u32 %s1339_s23, 4  ;;  %s42_s22 = int_to_ptr.vmem [resolvable:$true] %s41_s22  ;;  %s30_s24 = int_to_ptr.vmem [resolvable:$true] %s29_s24 }
   0x5   :  { %s1250_s25 = scalar_lea.vmem %s42_s22, 256  ;;  %p1255_p1 = scmp.lt.s32.totalorder %s42_s22, %s42_s22 }
   0x6   :  { %p1251_p0 = scmp.ne.s32.totalorder %s42_s22, %s1250_s25  ;;  %p1256_p2 = scmp.lt.s32.totalorder %s1250_s25, %s1250_s25 }
   0x8   :  { %p1257_p3 = por %p1256_p2, %p1255_p1 }
   0xa   :  { %p1258_p4 = pnand %p1257_p3, %p1251_p0 }
   0xc   :  { %1261 = shalt.err (!%p1258_p4)
}
   0xd   :  { %s1340_s26 = smov 128   ;;  %s1341_s27 = smov 8  }
   0xe   :  { %47 = dma.hbm_to_vmem [thread:$0]  %s1691_s2, 256, %s42_s22, [#allocation7], %s1340_s26, %s1340_s26, %s1341_s27  }
   0xf   :  { %s1270_s30 = scalar_lea.vmem %s30_s24, 256  ;;  %p1275_p6 = scmp.lt.s32.totalorder %s30_s24, %s30_s24 }
  0x10   :  { %p1271_p5 = scmp.ne.s32.totalorder %s30_s24, %s1270_s30  ;;  %p1276_p7 = scmp.lt.s32.totalorder %s1270_s30, %s1270_s30 }
  0x12   :  { %p1277_p8 = por %p1276_p7, %p1275_p6 }
  0x14   :  { %p1278_p9 = pnand %p1277_p8, %p1271_p5 }
  0x16   :  { %1281 = shalt.err (!%p1278_p9)
}
  0x17   :  { %35 = dma.hbm_to_vmem [thread:$0]  %s1690_s1, 256, %s30_s24, [#allocation3], %s1340_s26, %s1340_s26, %s1341_s27  }
  0x18   :  { %s1342_s15 = smov [#allocation8]  }
  0x19   :  { %s53_s16 = sshll.u32 %s1342_s15, 4  ;;  %s54_s16 = int_to_ptr.vmem [resolvable:$true] %s53_s16 }
  0x1a   :  { %s1290_s17 = scalar_lea.vmem %s54_s16, 256  ;;  %p1295_p11 = scmp.lt.s32.totalorder %s54_s16, %s54_s16 }
  0x1b   :  { %p1291_p10 = scmp.ne.s32.totalorder %s54_s16, %s1290_s17  ;;  %p1296_p12 = scmp.lt.s32.totalorder %s1290_s17, %s1290_s17 }
  0x1d   :  { %p1297_p13 = por %p1296_p12, %p1295_p11 }
  0x1f   :  { %p1298_p0 = pnand %p1297_p13, %p1291_p10 }
  0x21   :  { %1301 = shalt.err (!%p1298_p0)
}
  0x22   :  { %59 = dma.hbm_to_vmem [thread:$0]  %s1692_s3, 256, %s54_s16, [#allocation7], %s1340_s26, %s1340_s26, %s1341_s27  }
  0x23   :  { %1330 = dma.done.wait [#allocation3], 256  }
  0x24   :  { %1331 = vsyncadd [#allocation3], 4294967040 }
  0x25   :  { %1332 = dma.done.wait [#allocation7], 512  }
  0x26   :  { %1333 = vsyncadd [#allocation7], 4294966784  ;;  %vm100_vm0 = vcmask 130048   ;;  %v122_v0 = vld [vmem:[%s1694_s5 + $0x8] sm:$0xff]  ;;  %v121_v2 = vld [vmem:[%s1694_s5] sm:$0xff]  ;;  %vm245_vm1 = vcmask 64512  }
  0x27   :  { %v1435_v1 = vld [vmem:[%s1689_s0 + $0x8] sm:$0xff]  ;;  %1122 = vmatprep.subr.mxu0 %v122_v0  ;;  %v1442_v4 = vld [vmem:[#allocation6] sm:$0xff]  ;;  %v1066_v5 = vld [vmem:[%s1693_s4] ss:$0 sm:$0xff]  ;;  %vm715_vm2 = vcmask 130112  }
  0x28   :  { %v104_v3 = vsel %vm100_vm0, %v1435_v1, 0.0  ;;  %1123 = vmatpush3.msra.mxu0 %v122_v0  ;;  %v94_v6 = vmul.f32 %v1066_v5, %v1442_v4  ;;  %v1448_v7 = vld [vmem:[#allocation6 + $0x8] sm:$0xff]  ;;  %v1453_v8 = vld [vmem:[%s1689_s0] sm:$0xff]  ;;  %1126 = vmatprep.mubr.msk.f32.mxu0 %vm100_vm0, %v1442_v4  ;;  %v86_v12 = vld [vmem:[#allocation8 + $0x8] sm:$0xff] }
  0x29   :  { %105 = vadd.xlane.f32.xlu0 %v104_v3  ;;  %1124 = vmatprep.subr.mxu0 %v121_v2  ;;  %v101_v9 = vsel %vm100_vm0, %v1453_v8, 0.0  ;;  %v95_v10 = vmul.f32 %v1066_v5, %v1448_v7  ;;  %v85_v11 = vld [vmem:[#allocation8] sm:$0xff]  ;;  %v99_v24 = vld [vmem:[#allocation2 + $0x8] sm:$0xff] }
  0x2a   :  { %1125 = vmatpush3.msra.mxu0 %v121_v2  ;;  %1139 = vmatprep.mubr.msk.f32.mxu1 %vm100_vm0, %v1453_v8  ;;  %v1471_v13 = vld [vmem:[%s1695_s6] ss:$0 sm:$0xff]  ;;  %v114_v25 = vsel %vm100_vm0, %v99_v24, 0.0 }
  0x2b   :  { %1127 = vmatmul.mubr.msk.f32.vlgmr.msra.gmra.mxu0 %vm100_vm0, %v1448_v7  ;;  %v98_v14 = vld [vmem:[#allocation2] sm:$0xff] }
  0x2c   :  { %1129 = vmatprep.mubr.msk.f32.mxu0 %vm100_vm0, %v94_v6  ;;  %v111_v15 = vsel %vm100_vm0, %v98_v14, 0.0  ;;  %v1481_v22 = vld [vmem:[%s1698_s9] ss:$0 sm:$0xff]  ;;  %s1343_s9 = smov 120  }
  0x2d   :  { %102 = vadd.xlane.f32.xlu0 %v101_v9  ;;  %v1488_v23 = vld [vmem:[%s1699_s10] ss:$0 sm:$0xff] }
  0x2f   :  { %1130 = vmatmul.mubr.msk.f32.gmra.mxu0 %vm100_vm0, %v95_v10 }
  0x30   :  { %1132 = vmatprep.mubr.msk.f32.mxu0 %vm100_vm0, %v85_v11 }
  0x33   :  { %1133 = vmatmul.mubr.msk.f32.gmra.mxu0 %vm100_vm0, %v86_v12 }
  0x43   :  { %343 = vrot.lane.b32.xlu0 %v1471_v13, %s1341_s27 }
  0x62   :  { %112 = vadd.xlane.f32.xlu0 %v111_v15 }
  0xb2   :  { %v106_v26 = vpop.xlane.xlu0 %105 }
  0xb3   :  { %v108_v27 = vadd.f32 2.0, %v106_v26 }
  0xb5   :  { %1180 = vrsqrt.f32 %v108_v27 }
  0xb6   :  { %v103_v28 = vpop.xlane.xlu0 %102 }
  0xb7   :  { %v107_v29 = vadd.f32 2.0, %v103_v28 }
  0xb9   :  { %1182 = vrsqrt.f32 %v107_v29 }
  0xba   :  { %v344_v39 = vpop.permute.xlu0 %343 }
  0xc2   :  { %v1493_v30 = vpop.eup %1180 }
  0xc6   :  { %v1497_v34 = vpop.eup %1182 }
  0xeb   :  { %v1128_v16 = vpop.f32.mrf.mxu0  ;;  %v113_v41 = vpop.xlane.xlu0 %112 }
  0xec   :  { %v117_v42 = vadd.f32 2.0, %v113_v41 }
  0xed   :  { %v208_v17 = vpop.f32.mrf.mxu0 }
  0xee   :  { %1184 = vrsqrt.f32 %v117_v42 }
  0xef   :  { %v1131_v18 = vpop.f32.mrf.mxu0 }
  0xf1   :  { %v218_v19 = vpop.f32.mrf.mxu0 }
  0xf3   :  { %v1134_v20 = vpop.f32.mrf.mxu0 }
  0xf4   :  { %241 = vrot.lane.b32.xlu1 %v1134_v20, %s1341_s27 }
  0xf5   :  { %v228_v21 = vpop.f32.mrf.mxu0 }
  0xf8   :  { %239 = vrot.lane.b32.xlu1 %v228_v21, %s1341_s27 }
  0xfb   :  { %v1508_v45 = vpop.eup %1184 }
  0xfc   :  { %746 = vrot.lane.b32.xlu1 %v1481_v22, %s1341_s27  ;;  %v1516_v48 = vmul.f32 %v1508_v45, %v218_v19 }
 0x100   :  { %751 = vrot.lane.b32.xlu1 %v1488_v23, %s1341_s27 }
 0x124   :  { %115 = vadd.xlane.f32.xlu1 %v114_v25 }
 0x166   :  { %v242_v31 = vpop.permute.xlu1 %241 }
 0x167   :  { %v247_v32 = vsel %vm245_vm1, %v1128_v16, %v242_v31 }
 0x168   :  { %v249_v33 = vmul.f32 %v1493_v30, %v247_v32 }
 0x16a   :  { %1135 = vmatprep.subr.mxu1 %v249_v33  ;;  %v240_v35 = vpop.permute.xlu1 %239  ;;  %v251_v49 = vmul.f32 2.0, %v249_v33 }
 0x16b   :  { %v246_v36 = vsel %vm245_vm1, %v208_v17, %v240_v35  ;;  %1136 = vmatpush3.msra.mxu1 %v249_v33 }
 0x16c   :  { %v248_v37 = vmul.f32 %v1497_v34, %v246_v36 }
 0x16e   :  { %1137 = vmatprep.subr.mxu1 %v248_v37  ;;  %v1504_v38 = vpop.permute.xlu1 %746  ;;  %v250_v52 = vmul.f32 2.0, %v248_v37 }
 0x16f   :  { %1138 = vmatpush3.msra.mxu1 %v248_v37 }
 0x170   :  { %1140 = vmatmul.mubr.msk.f32.vlgmr.msra.gmra.mxu1 %vm100_vm0, %v1435_v1 }
 0x171   :  { %1146 = vmatprep.mubr.msk.f32.mxu1 %vm100_vm0, %v98_v14 }
 0x172   :  { %v1506_v40 = vpop.permute.xlu1 %751 }
 0x1ad   :  { %v116_v43 = vpop.xlane.xlu1 %115 }
 0x1ae   :  { %v118_v44 = vadd.f32 2.0, %v116_v43 }
 0x1b0   :  { %1186 = vrsqrt.f32 %v118_v44 }
 0x1bd   :  { %v1510_v46 = vpop.eup %1186 }
 0x1be   :  { %v1513_v47 = vmul.f32 %v1510_v46, %v1131_v18 }
 0x1c0   :  { %1142 = vmatprep.subr.mxu1 %v1513_v47 }
 0x1c1   :  { %1143 = vmatpush3.msra.mxu1 %v1513_v47 }
 0x1c2   :  { %1144 = vmatprep.subr.mxu1 %v1516_v48 }
 0x1c3   :  { %1145 = vmatpush3.msra.mxu1 %v1516_v48 }
 0x1c4   :  { %1147 = vmatmul.mubr.msk.f32.vlgmr.msra.gmra.mxu1 %vm100_vm0, %v99_v24 }
 0x1c5   :  { %1153 = vmatprep.mubr.msk.f32.mxu1 %vm100_vm0, %v1453_v8 }
 0x230   :  { %v1141_v50 = vpop.f32.mrf.mxu1 }
 0x231   :  { %v330_v51 = vadd.f32 %v1141_v50, %v251_v49 }
 0x232   :  { %v324_v53 = vpop.f32.mrf.mxu1 }
 0x233   :  { %v334_v54 = vmul.f32 %v1493_v30, %v330_v51  ;;  %v325_v55 = vadd.f32 %v324_v53, %v250_v52 }
 0x235   :  { %v1527_v56 = vadd.f32 %v1471_v13, %v334_v54  ;;  %v1529_v57 = vadd.f32 %v344_v39, %v334_v54  ;;  %v333_v58 = vmul.f32 %v1497_v34, %v325_v55 }
 0x237   :  { %v622_v59 = vmul.f32 %v1527_v56, %v1527_v56  ;;  %v727_v60 = vmul.f32 %v1529_v57, %v1529_v57  ;;  %v1537_v61 = vadd.f32 %v1471_v13, %v333_v58  ;;  %v1539_v62 = vadd.f32 %v344_v39, %v333_v58 }
 0x238   :  { %v1543_v63 = vmul.f32 %v1493_v30, %v1527_v56  ;;  %v612_v0 = vsel %vm245_vm1, %v1527_v56, 0.0  ;;  %v717_v2 = vsel %vm715_vm2, %v1529_v57, 0.0 }
 0x239   :  { %v611_v3 = vsel %vm245_vm1, %v1537_v61, 0.0  ;;  %v621_v5 = vmul.f32 %v1537_v61, %v1537_v61  ;;  %v716_v6 = vsel %vm715_vm2, %v1539_v62, 0.0  ;;  %v726_v8 = vmul.f32 %v1539_v62, %v1539_v62 }
 0x23a   :  { %1149 = vmatprep.subr.mxu1 %v1543_v63  ;;  %v613_v9 = vadd.f32 %v612_v0, %v611_v3  ;;  %v718_v10 = vadd.f32 %v717_v2, %v716_v6  ;;  %v1561_v11 = vmul.f32 %v1497_v34, %v1537_v61  ;;  %v624_v12 = vsel %vm245_vm1, %v622_v59, 0.0 }
 0x23b   :  { %1150 = vmatpush3.msra.mxu1 %v1543_v63  ;;  %v729_v14 = vsel %vm715_vm2, %v727_v60, 0.0  ;;  %v623_v15 = vsel %vm245_vm1, %v621_v5, 0.0  ;;  %v728_v16 = vsel %vm715_vm2, %v726_v8, 0.0 }
 0x23c   :  { %v614_v17 = vrot.slane %v613_v9, 4  ;;  %v625_v18 = vadd.f32 %v624_v12, %v623_v15  ;;  %v719_v19 = vrot.slane %v718_v10, 4  ;;  %v730_v20 = vadd.f32 %v729_v14, %v728_v16  ;;  %1151 = vmatprep.subr.mxu1 %v1561_v11 }
 0x23d   :  { %1152 = vmatpush3.msra.mxu1 %v1561_v11 }
 0x23e   :  { %v615_v21 = vadd.f32 %v614_v17, %v613_v9  ;;  %v626_v24 = vrot.slane %v625_v18, 4  ;;  %v720_v25 = vadd.f32 %v719_v19, %v718_v10  ;;  %v731_v26 = vrot.slane %v730_v20, 4  ;;  %1154 = vmatmul.mubr.msk.f32.vlgmr.msra.gmra.mxu1 %vm100_vm0, %v1435_v1 }
 0x240   :  { %v616_v27 = vrot.slane %v615_v21, 2  ;;  %v627_v28 = vadd.f32 %v626_v24, %v625_v18  ;;  %v721_v29 = vrot.slane %v720_v25, 2  ;;  %v732_v31 = vadd.f32 %v731_v26, %v730_v20 }
 0x242   :  { %v617_v32 = vadd.f32 %v616_v27, %v615_v21  ;;  %v628_v33 = vrot.slane %v627_v28, 2  ;;  %v722_v35 = vadd.f32 %v721_v29, %v720_v25  ;;  %v733_v36 = vrot.slane %v732_v31, 2 }
 0x244   :  { %v618_v37 = vrot.slane %v617_v32, 1  ;;  %v629_v39 = vadd.f32 %v628_v33, %v627_v28  ;;  %v723_v41 = vrot.slane %v722_v35, 1  ;;  %v734_v42 = vadd.f32 %v733_v36, %v732_v31  ;;  %v518_v33 = vld [vmem:[%s1696_s7] sm:$0xff] }
 0x245   :  { %v351_v31 = vmul.f32 2.0, %v1513_v47  ;;  %1156 = vmatprep.subr.mxu0 %v518_v33 }
 0x246   :  { %v619_v43 = vadd.f32 %v618_v37, %v617_v32  ;;  %v630_v44 = vrot.slane %v629_v39, 1  ;;  %v724_v49 = vadd.f32 %v723_v41, %v722_v35  ;;  %v735_v50 = vrot.slane %v734_v42, 1  ;;  %1157 = vmatpush3.msra.mxu0 %v518_v33 }
 0x248   :  { %v620_v51 = vmul.f32 0.0625, %v619_v43  ;;  %v631_v52 = vadd.f32 %v630_v44, %v629_v39  ;;  %v725_v53 = vmul.f32 0.0625, %v724_v49  ;;  %v736_v1 = vadd.f32 %v735_v50, %v734_v42 }
 0x24a   :  { %v632_v54 = vmul.f32 0.0625, %v631_v52  ;;  %v633_v55 = vmul.f32 %v620_v51, %v620_v51  ;;  %v635_v58 = vsub.f32 %v1537_v61, %v620_v51  ;;  %v737_v59 = vmul.f32 0.0625, %v736_v1 }
 0x24b   :  { %v738_v60 = vmul.f32 %v725_v53, %v725_v53  ;;  %v740_v0 = vsub.f32 %v1539_v62, %v725_v53  ;;  %v741_v2 = vsub.f32 %v1529_v57, %v725_v53  ;;  %v636_v3 = vsub.f32 %v1527_v56, %v620_v51 }
 0x24c   :  { %v634_v5 = vsub.f32 %v632_v54, %v633_v55 }
 0x24d   :  { %v739_v6 = vsub.f32 %v737_v59, %v738_v60 }
 0x24e   :  { %v637_v8 = vadd.f32 1e-05, %v634_v5 }
 0x24f   :  { %v742_v9 = vadd.f32 1e-05, %v739_v6  ;;  %v440_v6 = vmul.f32 2.0, %v1543_v63 }
 0x250   :  { %1188 = vrsqrt.f32 %v637_v8 }
 0x251   :  { %1190 = vrsqrt.f32 %v742_v9  ;;  %v439_v9 = vmul.f32 2.0, %v1561_v11 }
 0x25d   :  { %v1189_v10 = vpop.eup %1188 }
 0x25e   :  { %v1191_v12 = vpop.eup %1190  ;;  %v639_v14 = vmul.f32 %v1189_v10, %v635_v58  ;;  %v640_v15 = vmul.f32 %v1189_v10, %v636_v3 }
 0x25f   :  { %v744_v16 = vmul.f32 %v1191_v12, %v740_v0  ;;  %v745_v61 = vmul.f32 %v1191_v12, %v741_v2 }
 0x260   :  { %v647_v36 = vmul.f32 %v1481_v22, %v639_v14  ;;  %v648_v39 = vmul.f32 %v1481_v22, %v640_v15 }
 0x261   :  { %v750_v17 = vmul.f32 %v1504_v38, %v745_v61  ;;  %v749_v62 = vmul.f32 %v1504_v38, %v744_v16  ;;  %v350_v61 = vmul.f32 2.0, %v1516_v48 }
 0x262   :  { %v655_v37 = vadd.f32 %v1488_v23, %v647_v36  ;;  %v656_v42 = vadd.f32 %v1488_v23, %v648_v39 }
 0x263   :  { %v755_v57 = vadd.f32 %v1506_v40, %v750_v17  ;;  %v754_v56 = vadd.f32 %v1506_v40, %v749_v62 }
 0x264   :  { %v659_v41 = vmin.f32 %v655_v37, 0.0  ;;  %v660_v44 = vmin.f32 %v656_v42, 0.0  ;;  %vm657_vm5 = vcmp.gt.f32.partialorder %v655_v37, 0.0  ;;  %vm658_vm6 = vcmp.gt.f32.partialorder %v656_v42, 0.0 }
 0x265   :  { %v759_v18 = vmin.f32 %v755_v57, 0.0  ;;  %v758_v19 = vmin.f32 %v754_v56, 0.0  ;;  %vm757_vm3 = vcmp.gt.f32.partialorder %v755_v57, 0.0  ;;  %vm756_vm4 = vcmp.gt.f32.partialorder %v754_v56, 0.0 }
 0x266   :  { %v661_v43 = vmul.f32 1.442695, %v659_v41  ;;  %v663_v47 = vmul.f32 1.442695, %v660_v44 }
 0x267   :  { %v762_v20 = vmul.f32 1.442695, %v759_v18  ;;  %v760_v21 = vmul.f32 1.442695, %v758_v19 }
 0x269   :  { %1192 = vpow2.f32 %v762_v20 }
 0x26a   :  { %1194 = vpow2.f32 %v760_v21 }
 0x26b   :  { %1196 = vpow2.f32 %v661_v43 }
 0x26c   :  { %1198 = vpow2.f32 %v663_v47 }
 0x276   :  { %v1193_v24 = vpop.eup %1192 }
 0x277   :  { %v1195_v25 = vpop.eup %1194  ;;  %v1090_v26 = vadd.f32 -1.0, %v1193_v24 }
 0x278   :  { %v1089_v27 = vadd.f32 -1.0, %v1195_v25  ;;  %v1197_v49 = vpop.eup %1196 }
 0x279   :  { %v1579_v28 = vsel %vm757_vm3, %v755_v57, %v1090_v26  ;;  %v1085_v50 = vadd.f32 -1.0, %v1197_v49  ;;  %v1199_v51 = vpop.eup %1198 }
 0x27a   :  { %v846_v38 = vmul.f32 %v1579_v28, %v1579_v28  ;;  %v1583_v29 = vsel %vm756_vm4, %v754_v56, %v1089_v27  ;;  %v1086_v53 = vadd.f32 -1.0, %v1199_v51 }
 0x27b   :  { %v845_v40 = vmul.f32 %v1583_v29, %v1583_v29  ;;  %v1597_v52 = vsel %vm657_vm5, %v655_v37, %v1085_v50 }
 0x27c   :  { %851 = vrot.lane.b32.xlu1 %v846_v38, %s1343_s9  ;;  %v787_v58 = vmul.f32 %v1597_v52, %v1597_v52  ;;  %v1603_v60 = vsel %vm658_vm6, %v656_v42, %v1086_v53 }
 0x27d   :  { %849 = vrot.lane.b32.xlu0 %v845_v40, %s1343_s9  ;;  %v788_v2 = vmul.f32 %v1603_v60, %v1603_v60 }
 0x27e   :  { %v789_v0 = vsel %vm245_vm1, %v787_v58, 0.0 }
 0x27f   :  { %v792_v3 = vsel %vm245_vm1, %v788_v2, 0.0 }
 0x284   :  { %v1148_v32 = vpop.f32.mrf.mxu1 }
 0x285   :  { %v430_v35 = vadd.f32 %v1148_v32, %v351_v31 }
 0x286   :  { %v424_v5 = vpop.f32.mrf.mxu1 }
 0x287   :  { %v425_v17 = vadd.f32 %v424_v5, %v350_v61  ;;  %v434_v63 = vmul.f32 %v1510_v46, %v430_v35 }
 0x289   :  { %v433_v62 = vmul.f32 %v1508_v45, %v425_v17  ;;  %v436_v57 = vadd.f32 %v1471_v13, %v434_v63 }
 0x28b   :  { %v1619_v11 = vadd.f32 %v1471_v13, %v433_v62  ;;  %v670_v56 = vsel %vm245_vm1, %v436_v57, 0.0  ;;  %v680_v18 = vmul.f32 %v436_v57, %v436_v57 }
 0x28d   :  { %v682_v45 = vsel %vm245_vm1, %v680_v18, 0.0 }
 0x2ee   :  { %v852_v1 = vpop.permute.xlu1 %851 }
 0x2ef   :  { %v850_v54 = vpop.permute.xlu0 %849  ;;  %v858_v55 = vsel %vm245_vm1, %v852_v1, 0.0 }
 0x2f0   :  { %v855_v59 = vsel %vm245_vm1, %v850_v54, 0.0  ;;  %859 = vadd.xlane.f32.xlu1 %v858_v55 }
 0x2f1   :  { %856 = vadd.xlane.f32.xlu0 %v855_v59 }
 0x2f4   :  { %790 = vadd.xlane.f32.xlu1 %v789_v0 }
 0x2f8   :  { %793 = vadd.xlane.f32.xlu1 %v792_v3 }
 0x2fe   :  { %v1155_v8 = vpop.f32.mrf.mxu1 }
 0x2ff   :  { %v513_v10 = vadd.f32 %v1155_v8, %v440_v6 }
 0x300   :  { %v507_v12 = vpop.f32.mrf.mxu1 }
 0x301   :  { %v508_v14 = vadd.f32 %v507_v12, %v439_v9  ;;  %v517_v16 = vmul.f32 %v1493_v30, %v513_v10  ;;  %v679_v30 = vmul.f32 %v1619_v11, %v1619_v11 }
 0x303   :  { %v516_v15 = vmul.f32 %v1497_v34, %v508_v14  ;;  %v669_v34 = vsel %vm245_vm1, %v1619_v11, 0.0  ;;  %v681_v19 = vsel %vm245_vm1, %v679_v30, 0.0 }
 0x304   :  { %v671_v48 = vadd.f32 %v670_v56, %v669_v34  ;;  %v683_v20 = vadd.f32 %v682_v45, %v681_v19 }
 0x305   :  { %1158 = vmatprep.mubr.msk.f32.mxu0 %vm245_vm1, %v516_v15 }
 0x306   :  { %1159 = vmatmul.mubr.msk.f32.vlgmr.msra.gmra.mxu0 %vm245_vm1, %v517_v16  ;;  %v672_v46 = vrot.slane %v671_v48, 4  ;;  %v684_v24 = vrot.slane %v683_v20, 4 }
 0x308   :  { %v673_v21 = vadd.f32 %v672_v46, %v671_v48  ;;  %v685_v13 = vadd.f32 %v684_v24, %v683_v20 }
 0x30a   :  { %v674_v25 = vrot.slane %v673_v21, 2  ;;  %v686_v27 = vrot.slane %v685_v13, 2 }
 0x30c   :  { %v675_v26 = vadd.f32 %v674_v25, %v673_v21  ;;  %v687_v40 = vadd.f32 %v686_v27, %v685_v13 }
 0x30e   :  { %v676_v38 = vrot.slane %v675_v26, 1  ;;  %v688_v32 = vrot.slane %v687_v40, 1 }
 0x310   :  { %v677_v31 = vadd.f32 %v676_v38, %v675_v26  ;;  %v689_v35 = vadd.f32 %v688_v32, %v687_v40  ;;  %v1080_v38 = vld [vmem:[%s1697_s8] ss:$0 sm:$0xff]  ;;  %s1344_s8 = smov [#allocation9]  }
 0x311   :  { %s1040_s15 = sshll.u32 %s1344_s8, 4  ;;  %s1041_s15 = int_to_ptr.vmem [resolvable:$true] %s1040_s15 }
 0x312   :  { %v678_v33 = vmul.f32 0.0625, %v677_v31  ;;  %v690_v36 = vmul.f32 0.0625, %v689_v35  ;;  %s1302_s16 = scalar_lea.vmem %s1041_s15, 256  ;;  %p1307_p2 = scmp.lt.s32.totalorder %s1041_s15, %s1041_s15 }
 0x313   :  { %p1303_p1 = scmp.ne.s32.totalorder %s1041_s15, %s1302_s16  ;;  %p1308_p3 = scmp.lt.s32.totalorder %s1302_s16, %s1302_s16 }
 0x314   :  { %v691_v37 = vmul.f32 %v678_v33, %v678_v33  ;;  %v694_v6 = vsub.f32 %v436_v57, %v678_v33  ;;  %v693_v15 = vsub.f32 %v1619_v11, %v678_v33 }
 0x315   :  { %p1309_p4 = por %p1308_p3, %p1307_p2 }
 0x316   :  { %v692_v39 = vsub.f32 %v690_v36, %v691_v37 }
 0x317   :  { %p1310_p5 = pnand %p1309_p4, %p1303_p1 }
 0x318   :  { %v695_v41 = vadd.f32 1e-05, %v692_v39 }
 0x379   :  { %v860_v42 = vpop.xlane.xlu1 %859 }
 0x37a   :  { %v857_v43 = vpop.xlane.xlu0 %856  ;;  %1200 = vrsqrt.f32 %v860_v42  ;;  %vm870_vm7 = vcmp.eq.f32.partialorder %v860_v42, inf  ;;  %v873_v53 = vand.u32 2147483648, %v860_v42  ;;  %vm872_vm9 = vcmp.eq.f32.partialorder %v860_v42, 0.0 }
 0x37b   :  { %1202 = vrsqrt.f32 %v857_v43  ;;  %vm863_vm8 = vcmp.eq.f32.partialorder %v857_v43, inf  ;;  %v866_v54 = vand.u32 2147483648, %v857_v43  ;;  %vm865_vm10 = vcmp.eq.f32.partialorder %v857_v43, 0.0 }
 0x37c   :  { %1204 = vrsqrt.f32 %v695_v41 }
 0x37d   :  { %v791_v44 = vpop.xlane.xlu1 %790 }
 0x37e   :  { %1206 = vrsqrt.f32 %v791_v44  ;;  %vm797_vm11 = vcmp.eq.f32.partialorder %v791_v44, inf  ;;  %v800_v9 = vand.u32 2147483648, %v791_v44  ;;  %vm799_vm12 = vcmp.eq.f32.partialorder %v791_v44, 0.0 }
 0x387   :  { %v1201_v47 = vpop.eup %1200 }
 0x388   :  { %v1203_v49 = vpop.eup %1202  ;;  %v869_v50 = vmul.f32 %v1201_v47, %v860_v42 }
 0x389   :  { %v862_v51 = vmul.f32 %v1203_v49, %v857_v43  ;;  %v1205_v1 = vpop.eup %1204 }
 0x38a   :  { %v871_v55 = vsel %vm870_vm7, %v860_v42, %v869_v50  ;;  %v698_v12 = vmul.f32 %v1205_v1, %v694_v6  ;;  %v697_v61 = vmul.f32 %v1205_v1, %v693_v15 }
 0x38b   :  { %v1207_v58 = vpop.eup %1206  ;;  %v864_v59 = vsel %vm863_vm8, %v857_v43, %v862_v51  ;;  %v874_v0 = vsel %vm872_vm9, %v873_v53, %v871_v55 }
 0x38c   :  { %v867_v2 = vsel %vm865_vm10, %v866_v54, %v864_v59  ;;  %v876_v3 = vmax.f32 %v874_v0, 1e-12  ;;  %v796_v5 = vmul.f32 %v1207_v58, %v791_v44  ;;  %v700_v17 = vmul.f32 %v1481_v22, %v698_v12 }
 0x38d   :  { %v875_v8 = vmax.f32 %v867_v2, 1e-12  ;;  %v699_v63 = vmul.f32 %v1481_v22, %v697_v61 }
 0x38e   :  { %1208 = vrcp.f32 %v876_v3  ;;  %v798_v10 = vsel %vm797_vm11, %v791_v44, %v796_v5  ;;  %v702_v62 = vadd.f32 %v1488_v23, %v700_v17  ;;  %v794_v44 = vpop.xlane.xlu1 %793 }
 0x38f   :  { %1210 = vrcp.f32 %v875_v8  ;;  %v801_v14 = vsel %vm799_vm12, %v800_v9, %v798_v10  ;;  %v701_v34 = vadd.f32 %v1488_v23, %v699_v63  ;;  %vm804_vm15 = vcmp.eq.f32.partialorder %v794_v44, inf }
 0x390   :  { %v809_v16 = vmax.f32 %v801_v14, 1e-12  ;;  %v706_v57 = vmin.f32 %v702_v62, 0.0  ;;  %vm704_vm13 = vcmp.gt.f32.partialorder %v702_v62, 0.0  ;;  %v807_v50 = vand.u32 2147483648, %v794_v44 }
 0x391   :  { %v705_v19 = vmin.f32 %v701_v34, 0.0  ;;  %vm703_vm14 = vcmp.gt.f32.partialorder %v701_v34, 0.0  ;;  %vm806_vm2 = vcmp.eq.f32.partialorder %v794_v44, 0.0 }
 0x392   :  { %1212 = vrcp.f32 %v809_v16  ;;  %v709_v11 = vmul.f32 1.442695, %v706_v57 }
 0x393   :  { %v707_v22 = vmul.f32 1.442695, %v705_v19 }
 0x394   :  { %1214 = vpow2.f32 %v709_v11 }
 0x395   :  { %1216 = vpow2.f32 %v707_v22 }
 0x396   :  { %1218 = vrsqrt.f32 %v794_v44 }
 0x39b   :  { %v1209_v30 = vpop.eup %1208 }
 0x39c   :  { %v1211_v56 = vpop.eup %1210  ;;  %v880_v18 = vmul.f32 %v1209_v30, %v1579_v28 }
 0x39d   :  { %v878_v48 = vmul.f32 %v1211_v56, %v1583_v29 }
 0x39e   :  { %893 = vrot.lane.b32.xlu1 %v880_v18, %s1343_s9 }
 0x39f   :  { %v1213_v45 = vpop.eup %1212  ;;  %891 = vrot.lane.b32.xlu0 %v878_v48, %s1343_s9 }
 0x3a0   :  { %v812_v46 = vmul.f32 %v1213_v45, %v1597_v52 }
 0x3a1   :  { %v1215_v23 = vpop.eup %1214 }
 0x3a2   :  { %v1639_v20 = vmul.f32 20.0, %v812_v46  ;;  %v1088_v28 = vadd.f32 -1.0, %v1215_v23  ;;  %v1217_v29 = vpop.eup %1216 }
 0x3a3   :  { %v1087_v24 = vadd.f32 -1.0, %v1217_v29  ;;  %v1219_v47 = vpop.eup %1218 }
 0x3a4   :  { %1165 = vmatprep.mubr.msk.f32.mxu1 %vm245_vm1, %v1639_v20  ;;  %v1643_v21 = vsel %vm704_vm13, %v702_v62, %v1088_v28  ;;  %v803_v49 = vmul.f32 %v1219_v47, %v794_v44 }
 0x3a5   :  { %v818_v25 = vmul.f32 %v1643_v21, %v1643_v21  ;;  %v1647_v52 = vsel %vm703_vm14, %v701_v34, %v1087_v24 }
 0x3a6   :  { %v817_v26 = vmul.f32 %v1647_v52, %v1647_v52 }
 0x3a7   :  { %v822_v13 = vsel %vm245_vm1, %v818_v25, 0.0 }
 0x3a8   :  { %v819_v27 = vsel %vm245_vm1, %v817_v26, 0.0 }
 0x3be   :  { %823 = vadd.xlane.f32.xlu0 %v822_v13 }
 0x3c2   :  { %820 = vadd.xlane.f32.xlu1 %v819_v27 }
 0x3c6   :  { %v1160_v40 = vpop.f32.mrf.mxu0 }
 0x3c7   :  { %v604_v31 = vadd.f32 %v1160_v40, %v1080_v38 }
 0x3c8   :  { %v598_v32 = vpop.f32.mrf.mxu0 }
 0x3c9   :  { %v769_v33 = vsub.f32 %v1448_v7, %v604_v31  ;;  %608 = vst.msk [vmem:[#allocation9 + $0x8] sm:$0xff] %vm100_vm0, %v604_v31  ;;  %v599_v35 = vadd.f32 %v1080_v38, %v598_v32  ;;  %v805_v7 = vsel %vm804_vm15, %v794_v44, %v803_v49 }
 0x3ca   :  { %v808_v51 = vsel %vm806_vm2, %v807_v50, %v805_v7 }
 0x3cb   :  { %v771_v36 = vmul.f32 %v769_v33, %v769_v33  ;;  %v768_v37 = vsub.f32 %v1442_v4, %v599_v35  ;;  %607 = vst.msk [vmem:[#allocation9] sm:$0xff] %vm100_vm0, %v599_v35  ;;  %v810_v53 = vmax.f32 %v808_v51, 1e-12 }
 0x3cd   :  { %v770_v39 = vmul.f32 %v768_v37, %v768_v37  ;;  %v773_v42 = vsel %vm100_vm0, %v771_v36, 0.0  ;;  %1220 = vrcp.f32 %v810_v53 }
 0x3cf   :  { %v772_v41 = vsel %vm100_vm0, %v770_v39, 0.0 }
 0x3d0   :  { %v1662_v43 = vadd.f32 %v773_v42, %v772_v41 }
 0x3da   :  { %v1221_v4 = vpop.eup %1220 }
 0x3db   :  { %v814_v55 = vmul.f32 %v1221_v4, %v1603_v60 }
 0x3dd   :  { %v816_v58 = vmul.f32 20.0, %v814_v55 }
 0x410   :  { %v894_v1 = vpop.permute.xlu1 %893 }
 0x411   :  { %1161 = vmatprep.subr.msk.mxu1 %vm245_vm1, %v894_v1  ;;  %v892_v54 = vpop.permute.xlu0 %891 }
 0x412   :  { %1162 = vmatpush3.xpose.msk.msra.mxu1 %vm245_vm1, %v894_v1 }
 0x413   :  { %1163 = vmatprep.subr.msk.mxu1 %vm245_vm1, %v892_v54 }
 0x416   :  { %1164 = vmatpush3.xpose.msk.msra.mxu1 %vm245_vm1, %v892_v54 }
 0x419   :  { %1166 = vmatmul.mubr.msk.f32.vlgmr.msra.gmra.mxu1 %vm245_vm1, %v816_v58 }
 0x447   :  { %v824_v59 = vpop.xlane.xlu0 %823 }
 0x448   :  { %1222 = vrsqrt.f32 %v824_v59  ;;  %vm834_vm3 = vcmp.eq.f32.partialorder %v824_v59, inf  ;;  %v837_v5 = vand.u32 2147483648, %v824_v59  ;;  %vm836_vm4 = vcmp.eq.f32.partialorder %v824_v59, 0.0 }
 0x44b   :  { %v821_v0 = vpop.xlane.xlu1 %820 }
 0x44c   :  { %1224 = vrsqrt.f32 %v821_v0  ;;  %vm827_vm5 = vcmp.eq.f32.partialorder %v821_v0, inf  ;;  %v830_v60 = vand.u32 2147483648, %v821_v0  ;;  %vm829_vm6 = vcmp.eq.f32.partialorder %v821_v0, 0.0 }
 0x455   :  { %v1223_v2 = vpop.eup %1222 }
 0x456   :  { %v833_v3 = vmul.f32 %v1223_v2, %v824_v59 }
 0x458   :  { %v835_v6 = vsel %vm834_vm3, %v824_v59, %v833_v3 }
 0x459   :  { %v1225_v8 = vpop.eup %1224  ;;  %v838_v9 = vsel %vm836_vm4, %v837_v5, %v835_v6 }
 0x45a   :  { %v840_v10 = vmax.f32 %v838_v9, 1e-12  ;;  %v826_v12 = vmul.f32 %v1225_v8, %v821_v0 }
 0x45c   :  { %1226 = vrcp.f32 %v840_v10  ;;  %v828_v14 = vsel %vm827_vm5, %v821_v0, %v826_v12 }
 0x45d   :  { %v831_v15 = vsel %vm829_vm6, %v830_v60, %v828_v14 }
 0x45e   :  { %v839_v16 = vmax.f32 %v831_v15, 1e-12 }
 0x460   :  { %1228 = vrcp.f32 %v839_v16 }
 0x469   :  { %v1227_v61 = vpop.eup %1226 }
 0x46a   :  { %v844_v17 = vmul.f32 %v1227_v61, %v1643_v21 }
 0x46c   :  { %v882_v62 = vmul.f32 %v844_v17, %v816_v58 }
 0x46d   :  { %v1229_v63 = vpop.eup %1228 }
 0x46e   :  { %v886_v57 = vsel %vm245_vm1, %v882_v62, 0.0  ;;  %v842_v34 = vmul.f32 %v1229_v63, %v1647_v52 }
 0x46f   :  { %887 = vadd.xlane.f32.xlu0 %v886_v57 }
 0x470   :  { %v881_v30 = vmul.f32 %v842_v34, %v1639_v20 }
 0x472   :  { %v883_v56 = vsel %vm245_vm1, %v881_v30, 0.0 }
 0x473   :  { %884 = vadd.xlane.f32.xlu1 %v883_v56 }
 0x4d9   :  { %v1167_v18 = vpop.f32.mrf.mxu1 }
 0x4da   :  { %v983_v48 = vsel %vm100_vm0, %v1167_v18, -inf }
 0x4db   :  { %984 = vmax.xlane.f32.xlu0 %v983_v48  ;;  %v971_v11 = vpop.f32.mrf.mxu1 }
 0x4dc   :  { %v980_v19 = vsel %vm100_vm0, %v971_v11, -inf }
 0x4dd   :  { %981 = vmax.xlane.f32.xlu1 %v980_v19 }
 0x4f8   :  { %v888_v45 = vpop.xlane.xlu0 %887 }
 0x4fc   :  { %v885_v46 = vpop.xlane.xlu1 %884 }
 0x564   :  { %v985_v22 = vpop.xlane.xlu0 %984 }
 0x565   :  { %v987_v23 = vmax.f32 %v888_v45, %v985_v22 }
 0x566   :  { %v982_v28 = vpop.xlane.xlu1 %981 }
 0x567   :  { %v995_v29 = vsub.f32 %v1167_v18, %v987_v23  ;;  %v986_v21 = vmax.f32 %v885_v46, %v982_v28  ;;  %v989_v38 = vsub.f32 %v888_v45, %v987_v23 }
 0x569   :  { %v998_v24 = vmul.f32 1.442695, %v995_v29  ;;  %v994_v20 = vsub.f32 %v971_v11, %v986_v21  ;;  %v988_v40 = vsub.f32 %v885_v46, %v986_v21  ;;  %v992_v31 = vmul.f32 1.442695, %v989_v38 }
 0x56b   :  { %v996_v25 = vmul.f32 1.442695, %v994_v20  ;;  %1230 = vpow2.f32 %v998_v24  ;;  %v990_v32 = vmul.f32 1.442695, %v988_v40 }
 0x56d   :  { %1232 = vpow2.f32 %v996_v25 }
 0x56e   :  { %1234 = vpow2.f32 %v992_v31 }
 0x56f   :  { %1236 = vpow2.f32 %v990_v32 }
 0x578   :  { %v1231_v52 = vpop.eup %1230 }
 0x579   :  { %v1003_v13 = vsel %vm100_vm0, %v1231_v52, 0.0 }
 0x57a   :  { %v1233_v26 = vpop.eup %1232  ;;  %1004 = vadd.xlane.f32.xlu0 %v1003_v13 }
 0x57b   :  { %v1000_v27 = vsel %vm100_vm0, %v1233_v26, 0.0  ;;  %v1235_v33 = vpop.eup %1234  ;;  %vm1016_vm0 = vcmask 7168  }
 0x57c   :  { %1001 = vadd.xlane.f32.xlu1 %v1000_v27  ;;  %v1237_v37 = vpop.eup %1236 }
 0x580   :  { %775 = vadd.xlane.f32.xlu1 %v1662_v43 }
 0x603   :  { %v1005_v35 = vpop.xlane.xlu0 %1004 }
 0x604   :  { %v1007_v36 = vadd.f32 %v1235_v33, %v1005_v35 }
 0x605   :  { %v1002_v39 = vpop.xlane.xlu1 %1001 }
 0x606   :  { %1238 = vlog2.f32 %v1007_v36  ;;  %v1006_v41 = vadd.f32 %v1237_v37, %v1002_v39 }
 0x608   :  { %1240 = vlog2.f32 %v1006_v41 }
 0x609   :  { %v776_v42 = vpop.xlane.xlu1 %775 }
 0x60a   :  { %v777_v44 = vrot.slane %v776_v42, 4 }
 0x60c   :  { %v778_v47 = vadd.f32 %v777_v44, %v776_v42 }
 0x60e   :  { %v779_v49 = vrot.slane %v778_v47, 2 }
 0x610   :  { %v780_v7 = vadd.f32 %v779_v49, %v778_v47 }
 0x612   :  { %v781_v43 = vrot.slane %v780_v7, 1 }
 0x613   :  { %v1239_v50 = vpop.eup %1238 }
 0x614   :  { %v1011_v51 = vmul.f32 0.6931472, %v1239_v50  ;;  %v782_v53 = vadd.f32 %v781_v43, %v780_v7 }
 0x615   :  { %v1241_v4 = vpop.eup %1240 }
 0x616   :  { %v1009_v1 = vmul.f32 0.6931472, %v1241_v4  ;;  %1168 = vpush %v782_v53  ;;  %v1013_v54 = vadd.f32 %v1011_v51, %v987_v23 }
 0x618   :  { %v1012_v55 = vadd.f32 %v1009_v1, %v986_v21  ;;  %v1015_v58 = vsub.f32 %v1013_v54, %v888_v45 }
 0x61a   :  { %v1014_v59 = vsub.f32 %v1012_v55, %v885_v46  ;;  %v1018_v2 = vsel %vm1016_vm0, %v1015_v58, 0.0 }
 0x61c   :  { %v1017_v0 = vsel %vm1016_vm0, %v1014_v59, 0.0 }
 0x61d   :  { %v1019_v3 = vadd.f32 %v1018_v2, %v1017_v0 }
 0x61f   :  { %1020 = vadd.xlane.f32.xlu0 %v1019_v3 }
 0x620   :  { %1313 = shalt.err (!%p1310_p5)
}
 0x621   :  { %1046 = dma.vmem_to_hbm [thread:$0]  %s1041_s15, 256, %s1700_s11, [#allocation4], %s1340_s26, %s1340_s26, %s1341_s27  }
 0x622   :  { %s1345_s22 = smov [#allocation10]  }
 0x647   :  { %s1169_s18 = spop %1168 }
 0x648   :  { %s786_s1 = smul.f32 0.00390625, %s1169_s18 }
 0x6a8   :  { %v1021_v5 = vpop.xlane.xlu0 %1020 }
 0x6a9   :  { %v1022_v6 = vrot.slane %v1021_v5, 4 }
 0x6ab   :  { %v1023_v8 = vadd.f32 %v1022_v6, %v1021_v5 }
 0x6ad   :  { %v1024_v9 = vrot.slane %v1023_v8, 2 }
 0x6af   :  { %v1025_v10 = vadd.f32 %v1024_v9, %v1023_v8 }
 0x6b1   :  { %v1026_v12 = vrot.slane %v1025_v10, 1 }
 0x6b3   :  { %v1027_v60 = vadd.f32 %v1026_v12, %v1025_v10 }
 0x6b5   :  { %1170 = vpush %v1027_v60 }
 0x6e6   :  { %s1171_s19 = spop %1170 }
 0x6e7   :  { %s1031_s20 = smul.f32 0.0625, %s1171_s19 }
 0x6e9   :  { %s1032_s21 = sadd.f32 %s1031_s20, %s786_s1 }
 0x6eb   :  { %1034 = sst [smem:[#allocation10]] %s1032_s21 }
 0x6ec   :  { %1054 = dma.smem_to_hbm %s1345_s22, 16, %s1701_s12, [#allocation5]  }
 0x6ed   :  { %1334 = dma.done.wait [#allocation4], 256  }
 0x6ee   :  { %1335 = vsyncadd [#allocation4], 4294967040 }
 0x6ef   :  { %1336 = dma.done.wait [#allocation5], 16  }
 0x6f0   :  { %1337 = vsyncadd [#allocation5], 4294967280 }
 0x6f1   :  { %1061 = sfence }
 0x6f2   :  { %1062 = vsyncpa [#allocation3], 1 }
 0x6f3   :  { %1063 = vsyncpa [#allocation7], 1 }
 0x6f4   :  { %1064 = vsyncpa [#allocation4], 1 }
 0x6f5   :  { %1065 = vsyncpa [#allocation5], 1 }

</bundles_post_ra>
